<compile_context>
chip_gen: v7x
topology: tpu7x:2x2x1
jax: 0.10.0
libtpu: 0.0.40
codegen_flags: <defaults>
</compile_context>

<pallas_src>
import re

import jax
import jax.numpy as jnp
from jax import lax
from jax.experimental import pallas as pl
from jax.experimental.pallas import tpu as pltpu


def _round_up(x: int, m: int) -> int:
    return ((x + m - 1) // m) * m


# ---------------------------------------------------------------------------
# Kernels
# ---------------------------------------------------------------------------
def _linear_kernel_single_k(x_ref, w_ref, b_ref, o_ref):
    """Single K step: no accumulator scratch, write the output tile directly."""
    prod = lax.dot_general(
        x_ref[...], w_ref[...],
        dimension_numbers=(((1,), (1,)), ((), ())),   # x(M,K) · w(N,K) -> (M,N)
        preferred_element_type=jnp.float32,
    )
    o_ref[...] = (prod + b_ref[...]).astype(o_ref.dtype)


def _linear_kernel_multi_k(x_ref, w_ref, b_ref, o_ref, acc_ref):
    """K-tiled reduction with an f32 VMEM accumulator."""
    k = pl.program_id(2)
    prod = lax.dot_general(
        x_ref[...], w_ref[...],
        dimension_numbers=(((1,), (1,)), ((), ())),
        preferred_element_type=jnp.float32,
    )

    @pl.when(k == 0)
    def _():
        acc_ref[...] = prod            # direct assign: no zero-init + extra add

    @pl.when(k != 0)
    def _():
        acc_ref[...] += prod

    @pl.when(k == pl.num_programs(2) - 1)
    def _():
        # Bias added exactly once, on the final K step.
        o_ref[...] = (acc_ref[...] + b_ref[...]).astype(o_ref.dtype)


# ---------------------------------------------------------------------------
# Hardware queries & tile selection
# ---------------------------------------------------------------------------
def _tpu_generation() -> int:
    try:
        kind = jax.devices()[0].device_kind.lower()
        m = re.search(r"(\d+)", kind)
        if m:
            return int(m.group(1))
    except Exception:
        pass
    return 6


def _vmem_capacity_bytes(gen: int) -> int:
    try:
        return int(pltpu.get_tpu_info().vmem_capacity_bytes)
    except Exception:
        return (64 << 20) if gen >= 7 else (128 << 20)


def _pick_mn_tile(dim: int, cap: int, align: int) -> int:
    if dim <= cap:
        return dim                     # single full-extent block: no waste at all
    best_t, best_waste = align, None
    lo = max(align, _round_up(cap // 4, align))
    for t in range(lo, cap + 1, align):
        waste = pl.cdiv(dim, t) * t - dim
        if best_waste is None or waste < best_waste or (waste == best_waste and t > best_t):
            best_t, best_waste = t, waste
    return best_t


def _pick_k_tile(dim: int, cap: int):
    """Returns (tk, Kp).  Kp == dim unless zero-padding of K is required."""
    if dim <= cap:
        return dim, dim
    divisors = [t for t in range(128, cap + 1, 128) if dim % t == 0]
    if divisors:
        return max(divisors), dim      # exact tiling, no padding
    best_t, best_pad = 128, None
    for t in range(128, cap + 1, 128):
        pad = (-dim) % t
        if best_pad is None or pad < best_pad or (pad == best_pad and t > best_t):
            best_t, best_pad = t, pad
    return best_t, dim + best_pad


# ---------------------------------------------------------------------------
# Wrapper
# ---------------------------------------------------------------------------
def my_linear(x, weight, bias):
    """Pallas equivalent of myLinear.forward: x @ weight.T + bias."""
    M, K = x.shape
    N, K_w = weight.shape
    assert K == K_w, (
        f"Wrong Input Features. Please use tensor with {K_w} Input Features"
    )

    out_dtype = x.dtype
    x_isz = jnp.dtype(x.dtype).itemsize
    w_isz = jnp.dtype(weight.dtype).itemsize
    o_isz = jnp.dtype(out_dtype).itemsize
    sub = 8 * max(1, 4 // x_isz)       # sublane alignment: 8 f32 / 16 bf16 / 32 i8

    gen = _tpu_generation()
    vmem_cap = _vmem_capacity_bytes(gen)
    # ~48 MiB budget on v7x (64 MiB/TC), up to ~96 MiB on v5e/v6e (128 MiB).
    vmem_budget = min(vmem_cap * 3 // 4, 96 << 20)

    # Generation-aware tile caps (roofline-driven).
    if gen >= 7:
        cap_m, cap_n, cap_k = 1024, 1024, 512
    elif gen == 6:
        cap_m, cap_n, cap_k = 512, 1024, 512
    else:                              # v5e and older
        cap_m, cap_n, cap_k = 512, 512, 512

    def working_set(tm, tn, tk):
        return (2 * tm * tk * x_isz        # x tiles (double buffered)
                + 2 * tk * tn * w_isz      # weight tiles
                + 2 * tm * tn * o_isz      # output tiles
                + 2 * tn * 4               # bias tiles
                + tm * tn * 4              # f32 accumulator
                + (2 << 20))               # slack

    # Pick the biggest tiles whose pipeline working set fits the VMEM budget.
    while True:
        tm = _pick_mn_tile(M, cap_m, sub)
        tn = _pick_mn_tile(N, cap_n, 128)
        tk, Kp = _pick_k_tile(K, cap_k)
        if working_set(tm, tn, tk) <= vmem_budget:
            break
        if cap_m <= 128 and cap_n <= 256 and cap_k <= 256:
            break
        cap_m = max(128, cap_m // 2)
        cap_n = max(256, cap_n // 2)
        cap_k = max(256, cap_k // 2)

    # v7x has 2 TensorCores: keep the parallel grid at >= 2 tiles when possible.
    if gen >= 7 and pl.cdiv(M, tm) * pl.cdiv(N, tn) < 2:
        if N >= 256:
            tn = min(tn, _round_up(pl.cdiv(N, 2), 128))
        elif M >= 2 * sub:
            tm = min(tm, _round_up(pl.cdiv(M, 2), sub))

    gm, gn, gk = pl.cdiv(M, tm), pl.cdiv(N, tn), Kp // tk

    # Only K needs zero-padding (reduction correctness).  M/N edge blocks are
    # handled by Pallas' masked out-of-bounds stores.  Weight stays (N, K):
    # no per-call transpose.
    xp = x if Kp == K else jnp.pad(x, ((0, 0), (0, Kp - K)))
    wp = weight if Kp == K else jnp.pad(weight, ((0, 0), (0, Kp - K)))
    b2d = bias.reshape(1, N)

    vmem_limit = int(min(max(working_set(tm, tn, tk), 32 << 20), vmem_budget))

    cost = pl.CostEstimate(
        flops=2 * (gm * tm) * (gn * tn) * Kp,
        transcendentals=0,
        bytes_accessed=int(
            gn * M * Kp * x_isz        # x re-streamed once per N tile
            + gm * N * Kp * w_isz      # weight re-streamed once per M tile
            + gm * N * 4               # bias re-streamed once per M tile
            + M * N * o_isz            # output written once
        ),
    )

    if gk == 1:
        grid = (gm, gn)
        in_specs = [
            pl.BlockSpec((tm, tk), lambda i, j: (i, 0)),   # x tile
            pl.BlockSpec((tn, tk), lambda i, j: (j, 0)),   # weight tile (N,K)
            pl.BlockSpec((1, tn), lambda i, j: (0, j)),    # bias row tile
        ]
        out_spec = pl.BlockSpec((tm, tn), lambda i, j: (i, j))
        scratch = []
        kernel = _linear_kernel_single_k
        dims = ("parallel", "parallel")
    else:
        grid = (gm, gn, gk)
        in_specs = [
            pl.BlockSpec((tm, tk), lambda i, j, k: (i, k)),
            pl.BlockSpec((tn, tk), lambda i, j, k: (j, k)),
            pl.BlockSpec((1, tn), lambda i, j, k: (0, j)),
        ]
        out_spec = pl.BlockSpec((tm, tn), lambda i, j, k: (i, j))
        scratch = [pltpu.VMEM((tm, tn), jnp.float32)]
        kernel = _linear_kernel_multi_k
        dims = ("parallel", "parallel", "arbitrary")

    return pl.pallas_call(
        kernel,
        out_shape=jax.ShapeDtypeStruct((M, N), out_dtype),
        grid_spec=pltpu.PrefetchScalarGridSpec(
            num_scalar_prefetch=0,
            grid=grid,
            in_specs=in_specs,
            out_specs=out_spec,
            scratch_shapes=scratch,
        ),
        compiler_params=pltpu.CompilerParams(
            dimension_semantics=dims,
            vmem_limit_bytes=vmem_limit,
        ),
        cost_estimate=cost,
    )(xp, wp, b2d)


if __name__ == "__main__":
    # Deterministic stand-in for the module's torch.randn parameter init.
    in_features, out_features, batch = 32, 64, 8

    key = jax.random.PRNGKey(0)
    kx, kw, kb = jax.random.split(key, 3)
    x = jax.random.normal(kx, (batch, in_features), dtype=jnp.float32)
    weight = jax.random.normal(kw, (out_features, in_features), dtype=jnp.float32)
    bias = jax.random.normal(kb, (out_features,), dtype=jnp.float32)

    out = jax.block_until_ready(my_linear(x, weight, bias))
    ref = jnp.dot(x, weight.T, precision=lax.Precision.HIGHEST) + bias
    assert out.shape == (batch, out_features)
    assert jnp.allclose(out, ref, atol=5e-2, rtol=2e-2), float(jnp.max(jnp.abs(out - ref)))

    # Larger, non-aligned shapes: exercises the multi-step K reduction path,
    # full-extent (unpadded) M/N tiles and the v7x two-core N split.
    M2, K2, N2 = 300, 1536, 520
    kx2, kw2, kb2 = jax.random.split(jax.random.PRNGKey(1), 3)
    x2 = jax.random.normal(kx2, (M2, K2), dtype=jnp.float32)
    w2 = jax.random.normal(kw2, (N2, K2), dtype=jnp.float32)
    b2 = jax.random.normal(kb2, (N2,), dtype=jnp.float32)
    out2 = jax.block_until_ready(my_linear(x2, w2, b2))
    ref2 = jnp.dot(x2, w2.T, precision=lax.Precision.HIGHEST) + b2
    assert out2.shape == (M2, N2)
    assert jnp.allclose(out2, ref2, atol=1.0, rtol=2e-2), float(jnp.max(jnp.abs(out2 - ref2)))

    print("KERNEL_OK")
</pallas_src>

<mosaic_0001>
module attributes {stable_mosaic.version = 11 : i64} {
  func.func @_linear_kernel_single_k(%arg0: i32, %arg1: i32, %arg2: memref<8x32xf32, #tpu.memory_space<vmem>>, %arg3: memref<64x32xf32, #tpu.memory_space<vmem>>, %arg4: memref<1x64xf32, #tpu.memory_space<vmem>>, %arg5: memref<8x64xf32, #tpu.memory_space<vmem>>) attributes {dimension_semantics = [#tpu.dimension_semantics<parallel>, #tpu.dimension_semantics<parallel>], iteration_bounds = array<i64: 1, 1>, scalar_prefetch = 0 : i64, scratch_operands = 0 : i64, tpu.core_type = #tpu.core_type<tc>, window_params = [{transform_indices = @transform_0, window_bounds = array<i64: 8, 32>}, {transform_indices = @transform_1, window_bounds = array<i64: 64, 32>}, {transform_indices = @transform_2, window_bounds = array<i64: 1, 64>}, {transform_indices = @transform_3, window_bounds = array<i64: 8, 64>}]} {
    %c0 = arith.constant 0 : index
    %c0_0 = arith.constant 0 : index
    %0 = vector.load %arg2[%c0, %c0_0] : memref<8x32xf32, #tpu.memory_space<vmem>>, vector<8x32xf32>
    %c0_1 = arith.constant 0 : index
    %c0_2 = arith.constant 0 : index
    %1 = vector.load %arg3[%c0_1, %c0_2] : memref<64x32xf32, #tpu.memory_space<vmem>>, vector<64x32xf32>
    %cst = arith.constant dense<0.000000e+00> : vector<8x64xf32>
    %2 = tpu.matmul %0, %1, %cst {dimension_numbers = #tpu.dot_dimension_numbers<[1], [1], [0], [0], [0, 0, 1, 0], [], []>} : vector<8x32xf32>, vector<64x32xf32>, vector<8x64xf32> -> vector<8x64xf32>
    %c0_3 = arith.constant 0 : index
    %c0_4 = arith.constant 0 : index
    %3 = vector.load %arg4[%c0_3, %c0_4] : memref<1x64xf32, #tpu.memory_space<vmem>>, vector<1x64xf32>
    %4 = vector.broadcast %3 : vector<1x64xf32> to vector<8x64xf32>
    %5 = arith.addf %2, %4 : vector<8x64xf32>
    %c0_5 = arith.constant 0 : index
    %c0_6 = arith.constant 0 : index
    %6 = vector.load %arg5[%c0_5, %c0_6] : memref<8x64xf32, #tpu.memory_space<vmem>>, vector<8x64xf32>
    tpu.vector_store %arg5[%c0_5, %c0_6], %5 {strides = array<i32>} : memref<8x64xf32, #tpu.memory_space<vmem>>, vector<8x64xf32>,
    return
  }
  func.func @transform_0(%arg0: i32, %arg1: i32) -> (i32, i32) {
    %c0_i32 = arith.constant 0 : i32
    %c0_i32_0 = arith.constant 0 : i32
    return %arg0, %c0_i32 : i32, i32
  }
  func.func @transform_1(%arg0: i32, %arg1: i32) -> (i32, i32) {
    %c0_i32 = arith.constant 0 : i32
    %c0_i32_0 = arith.constant 0 : i32
    return %arg1, %c0_i32 : i32, i32
  }
  func.func @transform_2(%arg0: i32, %arg1: i32) -> (i32, i32) {
    %c0_i32 = arith.constant 0 : i32
    %c0_i32_0 = arith.constant 0 : i32
    return %c0_i32, %arg1 : i32, i32
  }
  func.func @transform_3(%arg0: i32, %arg1: i32) -> (i32, i32) {
    %c0_i32 = arith.constant 0 : i32
    return %arg0, %arg1 : i32, i32
  }
}

</mosaic_0001>

<bundles_post_ra>
// kernel: tpu_custom_call.1
= control target key start
LH: loop header
LB: loop body
LE: loop exit
PB: predicated region body
PF: predicated region fallthrough
CT: control target
= control target key end

     0   :  { %vm31_vm0 = vcmask 261120   ;;  %v227_v2 = vmov 0.0|0.0   ;;  %vm228_vm2 = vmmov 0   ;;  %v229_v5 = vmov 0.0   ;;  %s308_s0 = inlined_call_operand.vmem [shape: f32[8,32], index: 0, kind: input, shape index: {}]   ;;  %s309_s1 = inlined_call_operand.vmem [shape: f32[64,32], index: 1, kind: input, shape index: {}]   ;;  %s310_s2 = inlined_call_operand.vmem [shape: f32[1,64], index: 2, kind: input, shape index: {}]   ;;  %s311_s3 = inlined_call_operand.hbm [shape: f32[8,64], index: 3, kind: output, shape index: {}]  }
   0x1   :  { %v16_v0 = vld [vmem:[%s309_s1] sm:$0xff]  ;;  %v17_v1 = vld [vmem:[%s309_s1 + $0x8] sm:$0xff]  ;;  %183 = vmatprep.subr.bf16.mxu0 %v227_v2  ;;  %vm259_vm1 = vmpackc.low %vm31_vm0, %vm31_vm0  ;;  %180 = vmatprep.mubr.msk.f32.mxu0 %vm228_vm2, %v229_v5 }
   0x2   :  { %v184_v3 = vpack.c.bf16 %v17_v1, %v16_v0 }
   0x4   :  { %186 = vmatpush3.bf16.xpose.msk.msra.mxu0 %vm259_vm1, %v184_v3 }
   0x5   :  { %8 = vsyncpa [#allocation3], 0  ;;  %187 = vmatprep.subr.bf16.mxu0 %v227_v2  ;;  %v18_v6 = vld [vmem:[%s309_s1 + $0x10] sm:$0xff]  ;;  %v19_v7 = vld [vmem:[%s309_s1 + $0x18] sm:$0xff]  ;;  %s230_s5 = smov [#allocation2]   ;;  %vm129_vm3 = vcmask 523264  }
   0x6   :  { %v188_v8 = vpack.c.bf16 %v19_v7, %v18_v6  ;;  %v20_v9 = vld [vmem:[%s309_s1 + $0x20] sm:$0xff]  ;;  %v21_v10 = vld [vmem:[%s309_s1 + $0x28] sm:$0xff]  ;;  %v22_v12 = vld [vmem:[%s309_s1 + $0x30] sm:$0xff]  ;;  %s137_s6 = sshll.u32 %s230_s5, 4  ;;  %s138_s6 = int_to_ptr.vmem [resolvable:$true] %s137_s6 }
   0x7   :  { %v192_v11 = vpack.c.bf16 %v21_v10, %v20_v9  ;;  %v23_v13 = vld [vmem:[%s309_s1 + $0x38] sm:$0xff]  ;;  %v15_v15 = vld [vmem:[%s308_s0] sm:$0xff]  ;;  %s203_s1 = scalar_lea.vmem %s138_s6, 128  ;;  %p208_p1 = scmp.lt.s32.totalorder %s138_s6, %s138_s6 }
   0x8   :  { %v196_v14 = vpack.c.bf16 %v23_v13, %v22_v12  ;;  %v145_v16 = vld [vmem:[%s310_s2] ss:$0 sm:$0xff]  ;;  %p204_p0 = scmp.ne.s32.totalorder %s138_s6, %s203_s1  ;;  %p209_p2 = scmp.lt.s32.totalorder %s203_s1, %s203_s1 }
   0xa   :  { %p210_p3 = por %p209_p2, %p208_p1 }
   0xc   :  { %190 = vmatpush3.bf16.xpose.msk.msra.mxu0 %vm259_vm1, %v188_v8  ;;  %p211_p4 = pnand %p210_p3, %p204_p0 }
   0xd   :  { %191 = vmatprep.subr.bf16.mxu0 %v227_v2 }
  0x14   :  { %194 = vmatpush3.bf16.xpose.msk.msra.mxu0 %vm259_vm1, %v192_v11 }
  0x15   :  { %195 = vmatprep.subr.bf16.mxu0 %v227_v2 }
  0x1c   :  { %198 = vmatpush3.bf16.xpose.msk.msra.mxu0 %vm259_vm1, %v196_v14 }
  0x23   :  { %181 = vmatmul.mubr.msk.f32.vlgmr.msra.gmra.mrb[0].mxu0 %vm31_vm0, %v15_v15 }
  0xf6   :  { %v125_v17 = vpop.f32.mrb[0].mxu0 }
  0xf7   :  { %v126_v18 = vadd.f32 %v145_v16, %v125_v17  ;;  %v182_v19 = vpop.f32.mrb[1].mxu0 }
  0xf9   :  { %130 = vst.msk [vmem:[#allocation2] sm:$0xff] %vm129_vm3, %v126_v18 }
  0xfa   :  { %214 = shalt.err (!%p211_p4)
}
  0xfb   :  { %s215_s8 = scalar_lea.hbm %s311_s3, 128 }
  0xfc   :  { %p216_p5 = scmp.ne.s32.totalorder %s311_s3, %s215_s8  ;;  %p219_p6 = scmp.lt.u32.totalorder %s215_s8, %s311_s3 }
  0xfe   :  { %p221_p7 = pnand %p219_p6, %p216_p5 }
 0x100   :  { %224 = shalt.err (!%p221_p7)
}
 0x101   :  { %140 = dma.vmem_to_hbm [thread:$0]  %s138_s6, 128, %s311_s3, [#allocation3]  }
 0x102   :  { %225 = dma.done.wait [#allocation3], 128  }
 0x103   :  { %226 = vsyncadd [#allocation3], 4294967168 }
 0x104   :  { %144 = vsyncpa [#allocation3], 1 }

</bundles_post_ra>
